<compile_context>
chip_gen: v7x
topology: tpu7x:2x2x1
jax: 0.10.0
libtpu: 0.0.40
codegen_flags: <defaults>
</compile_context>

<pallas_src>
import jax
import jax.numpy as jnp
from jax.experimental import pallas as pl
from jax.experimental.pallas import tpu as pltpu


def _round_up(x: int, m: int) -> int:
    return ((x + m - 1) // m) * m


def _choose_tile(dim: int, align: int, max_tile: int) -> int:
    """Tile size: multiple of `align`, <= max_tile, minimizing padded extent.

    Ties are broken toward the larger tile (fewer grid blocks -> fewer HBM
    re-reads of the other operand).
    """
    dim_aligned = _round_up(dim, align)
    candidates = [c for c in (1024, 512, 256, 128) if align <= c <= max_tile]
    if not candidates or dim_aligned <= candidates[-1]:
        return min(dim_aligned, max_tile)
    best, best_key = None, None
    for c in candidates:
        key = (_round_up(dim, c), -c)  # (padded extent, prefer larger tile)
        if best_key is None or key < best_key:
            best, best_key = c, key
    return best


def _pad2d(a, rows: int, cols: int):
    """Zero-pad a 2-D array up to (rows, cols); no-op (no copy) if already there."""
    pr, pc = rows - a.shape[0], cols - a.shape[1]
    if pr == 0 and pc == 0:
        return a
    return jnp.pad(a, ((0, pr), (0, pc)))


def _linear_kernel(x_ref, wt_ref, b_ref, o_ref):
    """One (tm, tn) output tile; accumulates over the K grid axis directly in o_ref."""
    k = pl.program_id(2)

    @pl.when(k == 0)
    def _():
        o_ref[...] = jnp.zeros_like(o_ref)

    # Lane-dense MXU contraction: (tm, tk) @ (tk, tn) -> (tm, tn), f32 accumulate
    # straight into the VMEM-resident output block (same block for every k).
    o_ref[...] += jnp.dot(
        x_ref[...], wt_ref[...], preferred_element_type=jnp.float32
    )

    @pl.when(k == pl.num_programs(2) - 1)
    def _():
        # Bias added exactly once, on the final K step ((1, tn) broadcast).
        o_ref[...] += b_ref[...]


def make_linear_forward(
    weight,
    bias,
    *,
    tm_max: int = 512,
    tn_max: int = 512,
    tk_max: int = 1024,
    compute_dtype=jnp.float32,
    force_pallas: bool = False,
):
    """Build a jitted forward fn for y = x @ weight.T + bias (torch.nn.Linear).

    The weight transpose + padding is done ONCE here (not per forward call).
    Set compute_dtype=jnp.bfloat16 for bf16 MXU inputs with f32 accumulation.
    """
    weight = jnp.asarray(weight, jnp.float32)
    bias = jnp.asarray(bias, jnp.float32)
    N, K = weight.shape

    # N / K tiles depend only on the (static) weight shape -> pick them now.
    tn = _choose_tile(N, 128, tn_max)
    tk = _choose_tile(K, 128, tk_max)
    N_pad = _round_up(N, tn)
    K_pad = _round_up(K, tk)

    # One-time transpose + pad of the weight (eager, outside jit) and the bias.
    wt_p = _pad2d(weight.T, K_pad, N_pad).astype(compute_dtype)  # (K_pad, N_pad)
    b_p = _pad2d(bias.reshape(1, N), 1, N_pad)                   # (1, N_pad) f32

    in_itemsize = jnp.dtype(compute_dtype).itemsize

    @jax.jit
    def forward(x):
        if x.shape[-1] != K:
            raise ValueError(f"expected last dim {K}, got {x.shape[-1]}")
        lead = x.shape[:-1]
        x2 = x.reshape(-1, K)
        M = x2.shape[0]

        # Tiny-shape fast path: pallas_call fixed overhead + padding copies
        # dominate here; plain XLA is faster.
        if (not force_pallas) and M <= 64 and K <= 512 and N <= 512:
            y = (x2 @ wt_p[:K, :N]).astype(jnp.float32) + bias
            return y.reshape(*lead, N)

        # M tile (depends on the batch size only).
        tm = _choose_tile(M, 8, tm_max)
        M_pad = _round_up(M, tm)

        # v7x megacore: make sure the parallel (M, N) grid has >= 2 blocks so
        # both TensorCores get work; split M (weight padding is N/K only, so
        # this never invalidates the precomputed wt_p / b_p).
        if (M_pad // tm) * (N_pad // tn) < 2 and _round_up(M, 8) >= 16:
            tm = _round_up((_round_up(M, 8) + 1) // 2, 8)
            M_pad = _round_up(M, tm)

        x_p = _pad2d(x2, M_pad, K_pad).astype(compute_dtype)

        grid = (M_pad // tm, N_pad // tn, K_pad // tk)

        # VMEM budget: double-buffered inputs + output tile, capped at 48 MiB
        # so the same config fits v7x's 64 MiB VMEM per TensorCore.
        vmem_bytes = (
            2 * (tm * tk + tk * tn) * in_itemsize  # x / W^T tiles, double-buffered
            + 2 * tn * 4                           # bias tiles
            + 2 * tm * tn * 4                      # f32 output tile
        )
        vmem_limit = int(min(max(vmem_bytes + (8 << 20), 32 << 20), 48 << 20))

        cost = pl.CostEstimate(
            flops=2 * M * K * N,
            transcendentals=0,
            bytes_accessed=in_itemsize * (M * K + K * N) + 4 * (M * N + N),
        )

        out_p = pl.pallas_call(
            _linear_kernel,
            out_shape=jax.ShapeDtypeStruct((M_pad, N_pad), jnp.float32),
            grid_spec=pltpu.PrefetchScalarGridSpec(
                num_scalar_prefetch=0,
                grid=grid,
                in_specs=[
                    pl.BlockSpec((tm, tk), lambda i, j, k: (i, k)),  # x tile
                    pl.BlockSpec((tk, tn), lambda i, j, k: (k, j)),  # W^T tile
                    pl.BlockSpec((1, tn), lambda i, j, k: (0, j)),   # bias tile
                ],
                out_specs=pl.BlockSpec((tm, tn), lambda i, j, k: (i, j)),
            ),
            compiler_params=pltpu.CompilerParams(
                dimension_semantics=("parallel", "parallel", "arbitrary"),
                vmem_limit_bytes=vmem_limit,
            ),
            cost_estimate=cost,
        )(x_p, wt_p, b_p)

        y = out_p[:M, :N]
        return y.reshape(*lead, N)

    return forward


def init_linear_params(key, input_dim, output_dim):
    """Deterministic init mimicking torch.nn.Linear (uniform +/- 1/sqrt(in_features))."""
    k_w, k_b = jax.random.split(key)
    bound = 1.0 / jnp.sqrt(jnp.float32(input_dim))
    weight = jax.random.uniform(
        k_w, (output_dim, input_dim), dtype=jnp.float32, minval=-bound, maxval=bound
    )
    bias = jax.random.uniform(
        k_b, (output_dim,), dtype=jnp.float32, minval=-bound, maxval=bound
    )
    return weight, bias


if __name__ == "__main__":
    key = jax.random.PRNGKey(0)
    k_x, k_p, k_x2, k_p2 = jax.random.split(key, 4)

    # Small shape matching the module's typical use. force_pallas=True so the
    # Pallas kernel itself is exercised (the default wrapper would take the
    # tiny-shape XLA fast path at this size).
    batch, input_dim, output_dim = 8, 32, 16
    x = jax.random.normal(k_x, (batch, input_dim), dtype=jnp.float32)
    weight, bias = init_linear_params(k_p, input_dim, output_dim)

    fwd = make_linear_forward(weight, bias, force_pallas=True)
    y = jax.block_until_ready(fwd(x))
    y_ref = x @ weight.T + bias
    assert y.shape == (batch, output_dim)
    # Tolerance covers MXU f32 multi-pass vs XLA default matmul precision.
    assert jnp.allclose(y, y_ref, atol=1e-2, rtol=1e-2)

    # A larger case that exercises a multi-block (M, N, K) grid, direct o_ref
    # accumulation across K, and the megacore M-split.
    batch2, in2, out2 = 256, 384, 256
    x2 = jax.random.normal(k_x2, (batch2, in2), dtype=jnp.float32)
    w2, b2 = init_linear_params(k_p2, in2, out2)
    fwd2 = make_linear_forward(w2, b2)
    y2 = jax.block_until_ready(fwd2(x2))
    y2_ref = x2 @ w2.T + b2
    assert y2.shape == (batch2, out2)
    assert jnp.allclose(y2, y2_ref, atol=1e-2, rtol=1e-2)

    print("KERNEL_OK")
</pallas_src>

<mosaic_0001>
module attributes {stable_mosaic.version = 11 : i64} {
  func.func @_linear_kernel(%arg0: i32, %arg1: i32, %arg2: i32, %arg3: memref<8x128xf32, #tpu.memory_space<vmem>>, %arg4: memref<128x128xf32, #tpu.memory_space<vmem>>, %arg5: memref<1x128xf32, #tpu.memory_space<vmem>>, %arg6: memref<8x128xf32, #tpu.memory_space<vmem>>) attributes {dimension_semantics = [#tpu.dimension_semantics<parallel>, #tpu.dimension_semantics<parallel>, #tpu.dimension_semantics<arbitrary>], iteration_bounds = array<i64: 1, 1, 1>, scalar_prefetch = 0 : i64, scratch_operands = 0 : i64, tpu.core_type = #tpu.core_type<tc>, window_params = [{transform_indices = @transform_0, window_bounds = array<i64: 8, 128>}, {transform_indices = @transform_1, window_bounds = array<i64: 128, 128>}, {transform_indices = @transform_2, window_bounds = array<i64: 1, 128>}, {transform_indices = @transform_3, window_bounds = array<i64: 8, 128>}]} {
    %c0_i32 = arith.constant 0 : i32
    %0 = arith.cmpi eq, %arg2, %c0_i32 : i32
    %1 = arith.extui %0 : i1 to i32
    %c0_i32_0 = arith.constant 0 : i32
    %2 = arith.cmpi ne, %1, %c0_i32_0 : i32
    scf.if %2 {
      %cst_10 = arith.constant 0.000000e+00 : f32
      %12 = vector.broadcast %cst_10 : f32 to vector<8x128xf32>
      %c0_11 = arith.constant 0 : index
      %c0_12 = arith.constant 0 : index
      %13 = vector.load %arg6[%c0_11, %c0_12] : memref<8x128xf32, #tpu.memory_space<vmem>>, vector<8x128xf32>
      tpu.vector_store %arg6[%c0_11, %c0_12], %12 {strides = array<i32>} : memref<8x128xf32, #tpu.memory_space<vmem>>, vector<8x128xf32>,
    } else {
    }
    %c0 = arith.constant 0 : index
    %c0_1 = arith.constant 0 : index
    %3 = vector.load %arg6[%c0, %c0_1] : memref<8x128xf32, #tpu.memory_space<vmem>>, vector<8x128xf32>
    %c0_2 = arith.constant 0 : index
    %c0_3 = arith.constant 0 : index
    %4 = vector.load %arg3[%c0_2, %c0_3] : memref<8x128xf32, #tpu.memory_space<vmem>>, vector<8x128xf32>
    %c0_4 = arith.constant 0 : index
    %c0_5 = arith.constant 0 : index
    %5 = vector.load %arg4[%c0_4, %c0_5] : memref<128x128xf32, #tpu.memory_space<vmem>>, vector<128x128xf32>
    %cst = arith.constant dense<0.000000e+00> : vector<8x128xf32>
    %6 = tpu.matmul %4, %5, %cst {dimension_numbers = #tpu.dot_dimension_numbers<[1], [0], [0], [1], [0, 0, 1, 1], [], []>} : vector<8x128xf32>, vector<128x128xf32>, vector<8x128xf32> -> vector<8x128xf32>
    %7 = arith.addf %3, %6 : vector<8x128xf32>
    %c0_6 = arith.constant 0 : index
    %c0_7 = arith.constant 0 : index
    %8 = vector.load %arg6[%c0_6, %c0_7] : memref<8x128xf32, #tpu.memory_space<vmem>>, vector<8x128xf32>
    tpu.vector_store %arg6[%c0_6, %c0_7], %7 {strides = array<i32>} : memref<8x128xf32, #tpu.memory_space<vmem>>, vector<8x128xf32>,
    %c0_i32_8 = arith.constant 0 : i32
    %9 = arith.cmpi eq, %arg2, %c0_i32_8 : i32
    %10 = arith.extui %9 : i1 to i32
    %c0_i32_9 = arith.constant 0 : i32
    %11 = arith.cmpi ne, %10, %c0_i32_9 : i32
    scf.if %11 {
      %c0_10 = arith.constant 0 : index
      %c0_11 = arith.constant 0 : index
      %12 = vector.load %arg6[%c0_10, %c0_11] : memref<8x128xf32, #tpu.memory_space<vmem>>, vector<8x128xf32>
      %c0_12 = arith.constant 0 : index
      %c0_13 = arith.constant 0 : index
      %13 = vector.load %arg5[%c0_12, %c0_13] : memref<1x128xf32, #tpu.memory_space<vmem>>, vector<1x128xf32>
      %14 = vector.broadcast %13 : vector<1x128xf32> to vector<8x128xf32>
      %15 = arith.addf %12, %14 : vector<8x128xf32>
      %c0_14 = arith.constant 0 : index
      %c0_15 = arith.constant 0 : index
      %16 = vector.load %arg6[%c0_14, %c0_15] : memref<8x128xf32, #tpu.memory_space<vmem>>, vector<8x128xf32>
      tpu.vector_store %arg6[%c0_14, %c0_15], %15 {strides = array<i32>} : memref<8x128xf32, #tpu.memory_space<vmem>>, vector<8x128xf32>,
    } else {
    }
    return
  }
  func.func @transform_0(%arg0: i32, %arg1: i32, %arg2: i32) -> (i32, i32) {
    %c0_i32 = arith.constant 0 : i32
    return %arg0, %arg2 : i32, i32
  }
  func.func @transform_1(%arg0: i32, %arg1: i32, %arg2: i32) -> (i32, i32) {
    %c0_i32 = arith.constant 0 : i32
    return %arg2, %arg1 : i32, i32
  }
  func.func @transform_2(%arg0: i32, %arg1: i32, %arg2: i32) -> (i32, i32) {
    %c0_i32 = arith.constant 0 : i32
    %c0_i32_0 = arith.constant 0 : i32
    return %c0_i32, %arg1 : i32, i32
  }
  func.func @transform_3(%arg0: i32, %arg1: i32, %arg2: i32) -> (i32, i32) {
    %c0_i32 = arith.constant 0 : i32
    return %arg0, %arg1 : i32, i32
  }
}

</mosaic_0001>

<bundles_post_ra>
// kernel: forward.1
= control target key start
LH: loop header
LB: loop body
LE: loop exit
PB: predicated region body
PF: predicated region fallthrough
CT: control target
= control target key end

     0   :  { %8 = vsyncpa [#allocation3], 0  ;;  %s341_s0 = inlined_call_operand.vmem [shape: f32[8,128], index: 0, kind: input, shape index: {}]   ;;  %s342_s1 = inlined_call_operand.hbm [shape: f32[128,128], index: 1, kind: input, shape index: {}]   ;;  %s343_s2 = inlined_call_operand.vmem [shape: f32[1,128], index: 2, kind: input, shape index: {}]   ;;  %s344_s3 = inlined_call_operand.hbm [shape: f32[8,128], index: 3, kind: output, shape index: {}]  }
   0x1   :  { %9 = vsyncpa [#allocation4], 0  ;;  %s284_s12 = smov [#allocation2]   ;;  %s236_s16 = scalar_lea.hbm %s342_s1, 2048 }
   0x2   :  { %s17_s13 = sshll.u32 %s284_s12, 4  ;;  %p237_p0 = scmp.ne.s32.totalorder %s342_s1, %s236_s16  ;;  %s18_s13 = int_to_ptr.vmem [resolvable:$true] %s17_s13 }
   0x3   :  { %p240_p1 = scmp.lt.u32.totalorder %s236_s16, %s342_s1 }
   0x5   :  { %p242_p2 = pnand %p240_p1, %p237_p0 }
   0x7   :  { %245 = shalt.err (!%p242_p2)
}
   0x8   :  { %s246_s21 = scalar_lea.vmem %s18_s13, 2048  ;;  %p251_p4 = scmp.lt.s32.totalorder %s18_s13, %s18_s13 }
   0x9   :  { %p247_p3 = scmp.ne.s32.totalorder %s18_s13, %s246_s21  ;;  %p252_p5 = scmp.lt.s32.totalorder %s246_s21, %s246_s21 }
   0xb   :  { %p253_p6 = por %p252_p5, %p251_p4 }
   0xd   :  { %p254_p7 = pnand %p253_p6, %p247_p3 }
   0xf   :  { %257 = shalt.err (!%p254_p7)
}
  0x10   :  { %s285_s22 = smov 128   ;;  %s286_s23 = smov 8  }
  0x11   :  { %23 = dma.hbm_to_vmem [thread:$0]  %s342_s1, 2048, %s18_s13, [#allocation3], %s285_s22, %s285_s22, %s286_s23  }
  0x12   :  { %280 = dma.done.wait [#allocation3], 2048  }
  0x13   :  { %281 = vsyncadd [#allocation3], 4294965248  ;;  %v287_v0 = vmov 0.0|0.0   ;;  %vm288_vm0 = vmmov 0   ;;  %v289_v1 = vmov 0.0   ;;  %v36_v2 = vld [vmem:[#allocation2] sm:$0xff] }
  0x14   :  { %205 = vmatprep.subr.bf16.mxu0 %v287_v0  ;;  %202 = vmatprep.mubr.msk.f32.mxu0 %vm288_vm0, %v289_v1  ;;  %v37_v3 = vld [vmem:[#allocation2 + $0x8] sm:$0xff]  ;;  %v38_v4 = vld [vmem:[#allocation2 + $0x10] sm:$0xff]  ;;  %v39_v6 = vld [vmem:[#allocation2 + $0x18] sm:$0xff]  ;;  %s290_s29 = smov [#allocation5]  }
  0x15   :  { %v206_v5 = vpack.c.bf16 %v37_v3, %v36_v2  ;;  %v209_v7 = vpack.c.bf16 %v39_v6, %v38_v4  ;;  %v40_v8 = vld [vmem:[#allocation2 + $0x20] sm:$0xff]  ;;  %v41_v9 = vld [vmem:[#allocation2 + $0x28] sm:$0xff]  ;;  %v42_v11 = vld [vmem:[#allocation2 + $0x30] sm:$0xff]  ;;  %s143_s30 = sshll.u32 %s290_s29, 4  ;;  %s144_s30 = int_to_ptr.vmem [resolvable:$true] %s143_s30 }
  0x16   :  { %v212_v10 = vpack.c.bf16 %v41_v9, %v40_v8  ;;  %v43_v12 = vld [vmem:[#allocation2 + $0x38] sm:$0xff]  ;;  %v44_v14 = vld [vmem:[#allocation2 + $0x40] sm:$0xff]  ;;  %v45_v15 = vld [vmem:[#allocation2 + $0x48] sm:$0xff]  ;;  %s258_s4 = scalar_lea.vmem %s144_s30, 128  ;;  %p263_p9 = scmp.lt.s32.totalorder %s144_s30, %s144_s30 }
  0x17   :  { %207 = vmatpush3.bf16.msra.mxu0 %v206_v5  ;;  %v215_v13 = vpack.c.bf16 %v43_v12, %v42_v11  ;;  %v218_v16 = vpack.c.bf16 %v45_v15, %v44_v14  ;;  %v46_v17 = vld [vmem:[#allocation2 + $0x50] sm:$0xff]  ;;  %v47_v18 = vld [vmem:[#allocation2 + $0x58] sm:$0xff]  ;;  %v48_v20 = vld [vmem:[#allocation2 + $0x60] sm:$0xff]  ;;  %p259_p8 = scmp.ne.s32.totalorder %s144_s30, %s258_s4  ;;  %p264_p10 = scmp.lt.s32.totalorder %s258_s4, %s258_s4 }
  0x18   :  { %208 = vmatprep.subr.bf16.mxu0 %v287_v0  ;;  %v221_v19 = vpack.c.bf16 %v47_v18, %v46_v17  ;;  %v49_v21 = vld [vmem:[#allocation2 + $0x68] sm:$0xff]  ;;  %v50_v23 = vld [vmem:[#allocation2 + $0x70] sm:$0xff]  ;;  %v51_v24 = vld [vmem:[#allocation2 + $0x78] sm:$0xff] }
  0x19   :  { %v224_v22 = vpack.c.bf16 %v49_v21, %v48_v20  ;;  %v227_v25 = vpack.c.bf16 %v51_v24, %v50_v23  ;;  %v35_v26 = vld [vmem:[%s341_s0] sm:$0xff]  ;;  %p265_p11 = por %p264_p10, %p263_p9 }
  0x1a   :  { %v152_v28 = vld [vmem:[%s343_s2] ss:$0 sm:$0xff] }
  0x1b   :  { %210 = vmatpush3.bf16.msra.mxu0 %v209_v7  ;;  %p266_p12 = pnand %p265_p11, %p259_p8 }
  0x1c   :  { %211 = vmatprep.subr.bf16.mxu0 %v287_v0 }
  0x1f   :  { %213 = vmatpush3.bf16.msra.mxu0 %v212_v10 }
  0x20   :  { %214 = vmatprep.subr.bf16.mxu0 %v287_v0 }
  0x23   :  { %216 = vmatpush3.bf16.msra.mxu0 %v215_v13 }
  0x24   :  { %217 = vmatprep.subr.bf16.mxu0 %v287_v0 }
  0x27   :  { %219 = vmatpush3.bf16.msra.mxu0 %v218_v16 }
  0x28   :  { %220 = vmatprep.subr.bf16.mxu0 %v287_v0 }
  0x2b   :  { %222 = vmatpush3.bf16.msra.mxu0 %v221_v19 }
  0x2c   :  { %223 = vmatprep.subr.bf16.mxu0 %v287_v0 }
  0x2f   :  { %225 = vmatpush3.bf16.msra.mxu0 %v224_v22 }
  0x30   :  { %226 = vmatprep.subr.bf16.mxu0 %v287_v0 }
  0x33   :  { %228 = vmatpush3.bf16.msra.mxu0 %v227_v25 }
  0x36   :  { %203 = vmatmul.mubr.f32.vlgmr.msra.gmra.mrb[0].mxu0 %v35_v26 }
 0x109   :  { %v118_v27 = vpop.f32.mrb[0].mxu0 }
 0x10a   :  { %v204_v29 = vpop.f32.mrb[1].mxu0  ;;  %v135_v30 = vadd.f32 %v152_v28, %v118_v27 }
 0x10c   :  { %136 = vst [vmem:[#allocation5] sm:$0xff] %v135_v30 }
 0x10d   :  { %269 = shalt.err (!%p266_p12)
}
 0x10e   :  { %s270_s6 = scalar_lea.hbm %s344_s3, 128 }
 0x10f   :  { %p271_p13 = scmp.ne.s32.totalorder %s344_s3, %s270_s6  ;;  %p274_p0 = scmp.lt.u32.totalorder %s270_s6, %s344_s3 }
 0x111   :  { %p276_p1 = pnand %p274_p0, %p271_p13 }
 0x113   :  { %279 = shalt.err (!%p276_p1)
}
 0x114   :  { %146 = dma.vmem_to_hbm [thread:$0]  %s144_s30, 128, %s344_s3, [#allocation4]  }
 0x115   :  { %282 = dma.done.wait [#allocation4], 128  }
 0x116   :  { %283 = vsyncadd [#allocation4], 4294967168 }
 0x117   :  { %150 = vsyncpa [#allocation3], 1 }
 0x118   :  { %151 = vsyncpa [#allocation4], 1 }

</bundles_post_ra>
